<compile_context>
chip_gen: v7x
topology: tpu7x:2x2x1
jax: 0.10.0
libtpu: 0.0.40
codegen_flags: <defaults>
</compile_context>

<pallas_src>
import functools
import numpy as np
import jax
import jax.numpy as jnp
from jax.experimental import pallas as pl
from jax.experimental.pallas import tpu as pltpu

LANES = 128
ROW_CHUNK = 256   # in-kernel sub-tile (rows): keeps dot->cos->store vreg-resident


def _round_up(x: int, m: int) -> int:
    return ((x + m - 1) // m) * m


def time_encode_kernel(ts_ref, rhs_ref, o_ref, *, chunk, num_chunks):
    # ts_ref:  (TM, G+1)  packed timestamps; last column is ones (phase fold)
    # rhs_ref: (G+1, W)   block-diagonal freq matrix; last row is the phase
    # o_ref:   (TM, W)    lane-dense output (W is a multiple of 128)
    rhs = rhs_ref[...]                       # tiny (<= 8x128 f32); load once

    def body(c, carry):
        r0 = pl.multiple_of(c * chunk, chunk)
        prod = jnp.dot(
            ts_ref[pl.ds(r0, chunk), :], rhs,
            preferred_element_type=jnp.float32,
            precision=jax.lax.Precision.HIGHEST,   # exact f32 on the MXU
        )
        o_ref[pl.ds(r0, chunk), :] = jnp.cos(prod).astype(o_ref.dtype)
        return carry

    jax.lax.fori_loop(0, num_chunks, body, 0, unroll=True)


def time_encode(ts: jax.Array, basis_freq: jax.Array, phase: jax.Array,
                *, tile_rows: int = 2048, out_dtype=jnp.float32) -> jax.Array:
    """ts: [B, S]; basis_freq, phase: [D]  ->  [B, S, D] (out_dtype)."""
    B, S = ts.shape
    D = basis_freq.shape[0]

    # Lane packing: G encoding groups per 128-lane stripe when D divides 128;
    # otherwise keep G=1 but pad the feature dim to the next multiple of 128
    # so the output stays lane-dense (padding sliced off below).
    if D <= LANES and LANES % D == 0:
        G, Dp = LANES // D, D
    else:
        G, Dp = 1, _round_up(D, LANES)
    W = G * Dp

    N = B * S
    Np = pl.cdiv(N, G)
    Np_pad = _round_up(Np, 8)               # f32 sublane multiple

    # Tile size: large to amortize ~0.35us/step, but
    #   * >= 2 grid steps whenever possible (v7x has 2 TCs on the parallel axis),
    #   * a multiple of the in-kernel row chunk.
    TM = min(tile_rows, Np_pad)
    if Np_pad > 8:
        TM = min(TM, _round_up(max(Np_pad // 2, 8), 8))
    if TM >= ROW_CHUNK:
        TM = (TM // ROW_CHUNK) * ROW_CHUNK
        chunk = ROW_CHUNK
    else:
        chunk = TM
    num_chunks = TM // chunk
    grid = (pl.cdiv(Np_pad, TM),)

    # Pack ts; append a column of ones so the phase-add folds into the matmul.
    ts_flat = ts.reshape(-1).astype(jnp.float32)
    pad = Np_pad * G - N
    if pad:
        ts_flat = jnp.pad(ts_flat, (0, pad))
    ts_packed = ts_flat.reshape(Np_pad, G)
    ts_aug = jnp.concatenate(
        [ts_packed, jnp.ones((Np_pad, 1), jnp.float32)], axis=1)        # (Np_pad, G+1)

    freq_row = jnp.zeros((1, Dp), jnp.float32).at[0, :D].set(
        basis_freq.astype(jnp.float32))
    phase_row = jnp.zeros((1, Dp), jnp.float32).at[0, :D].set(
        phase.astype(jnp.float32))
    freq_blockdiag = jnp.kron(jnp.eye(G, dtype=jnp.float32), freq_row)   # (G, W)
    rhs = jnp.concatenate(
        [freq_blockdiag, jnp.tile(phase_row, (1, G))], axis=0)           # (G+1, W)

    out_packed = pl.pallas_call(
        functools.partial(time_encode_kernel, chunk=chunk, num_chunks=num_chunks),
        out_shape=jax.ShapeDtypeStruct((Np_pad, W), out_dtype),
        grid_spec=pltpu.PrefetchScalarGridSpec(
            num_scalar_prefetch=0,
            grid=grid,
            in_specs=[
                pl.BlockSpec((TM, G + 1), lambda i: (i, 0)),
                pl.BlockSpec((G + 1, W), lambda i: (0, 0)),
            ],
            out_specs=pl.BlockSpec((TM, W), lambda i: (i, 0)),
        ),
        compiler_params=pltpu.CompilerParams(
            dimension_semantics=("parallel",),
        ),
    )(ts_aug, rhs)

    # Row-major-preserving unpack:
    # (Np_pad, G*Dp) -> (Np_pad*G, Dp) -> [:N, :D] -> (B, S, D)
    return out_packed.reshape(Np_pad * G, Dp)[:N, :D].reshape(B, S, D)


def reference_time_encode(ts, basis_freq, phase):
    map_ts = ts[:, :, None] * basis_freq[None, None, :] + phase[None, None, :]
    return jnp.cos(map_ts)


if __name__ == "__main__":
    expand_dim = 32   # time_dim D
    B, S = 2, 8

    # Deterministic parameter init, matching PyTorch __init__:
    basis_freq = jnp.asarray(
        1.0 / 10.0 ** np.linspace(0, 9, expand_dim), dtype=jnp.float32)
    phase = jnp.zeros((expand_dim,), dtype=jnp.float32)

    key = jax.random.PRNGKey(0)
    ts = jax.random.uniform(key, (B, S), dtype=jnp.float32) * 100.0

    out = jax.block_until_ready(time_encode(ts, basis_freq, phase))
    ref = reference_time_encode(ts, basis_freq, phase)
    np.testing.assert_allclose(np.asarray(out), np.asarray(ref),
                               rtol=1e-4, atol=5e-5)

    # Multi-step parallel grid + edge block + row padding.
    B2, S2 = 8, 1000
    ts2 = jax.random.uniform(jax.random.PRNGKey(1), (B2, S2), dtype=jnp.float32) * 100.0
    out2 = jax.block_until_ready(time_encode(ts2, basis_freq, phase))
    ref2 = reference_time_encode(ts2, basis_freq, phase)
    np.testing.assert_allclose(np.asarray(out2), np.asarray(ref2),
                               rtol=1e-4, atol=5e-5)

    # D that does NOT divide 128 (lane-padded path) + nonzero phase (fold check).
    D3 = 100
    bf3 = jnp.asarray(1.0 / 10.0 ** np.linspace(0, 9, D3), dtype=jnp.float32)
    ph3 = jax.random.normal(jax.random.PRNGKey(2), (D3,), dtype=jnp.float32) * 0.1
    ts3 = jax.random.uniform(jax.random.PRNGKey(3), (4, 300), dtype=jnp.float32) * 100.0
    out3 = jax.block_until_ready(time_encode(ts3, bf3, ph3))
    ref3 = reference_time_encode(ts3, bf3, ph3)
    np.testing.assert_allclose(np.asarray(out3), np.asarray(ref3),
                               rtol=1e-4, atol=5e-5)

    print("KERNEL_OK")
</pallas_src>

<mosaic_0001>
module attributes {stable_mosaic.version = 11 : i64} {
  func.func @time_encode_kernel(%arg0: i32, %arg1: memref<8x5xf32, #tpu.memory_space<vmem>>, %arg2: memref<5x128xf32, #tpu.memory_space<vmem>>, %arg3: memref<8x128xf32, #tpu.memory_space<vmem>>) attributes {dimension_semantics = [#tpu.dimension_semantics<parallel>], iteration_bounds = array<i64: 1>, scalar_prefetch = 0 : i64, scratch_operands = 0 : i64, tpu.core_type = #tpu.core_type<tc>, window_params = [{transform_indices = @transform_0, window_bounds = array<i64: 8, 5>}, {pipeline_mode = #tpu.pipeline_mode<synchronous>, transform_indices = @transform_1, window_bounds = array<i64: 5, 128>}, {transform_indices = @transform_2, window_bounds = array<i64: 8, 128>}]} {
    %c0 = arith.constant 0 : index
    %c0_0 = arith.constant 0 : index
    %0 = vector.load %arg2[%c0, %c0_0] : memref<5x128xf32, #tpu.memory_space<vmem>>, vector<5x128xf32>
    %c0_i32 = arith.constant 0 : i32
    %c8_i32 = arith.constant 8 : i32
    %1 = arith.muli %c0_i32, %c8_i32 : i32
    %2 = tpu.assume_multiple %1, 8 : i32
    %3 = arith.index_cast %2 : i32 to index
    %c0_1 = arith.constant 0 : index
    %4 = vector.load %arg1[%3, %c0_1] : memref<8x5xf32, #tpu.memory_space<vmem>>, vector<8x5xf32>
    %cst = arith.constant dense<0.000000e+00> : vector<8x128xf32>
    %5 = tpu.matmul %4, %0, %cst {dimension_numbers = #tpu.dot_dimension_numbers<[1], [0], [0], [1], [0, 0, 1, 1], [], []>, precision = #tpu.contract_precision<fp32>} : vector<8x5xf32>, vector<5x128xf32>, vector<8x128xf32> -> vector<8x128xf32>
    %6 = math.cos %5 : vector<8x128xf32>
    %7 = arith.index_cast %2 : i32 to index
    %c0_2 = arith.constant 0 : index
    %8 = vector.load %arg3[%7, %c0_2] : memref<8x128xf32, #tpu.memory_space<vmem>>, vector<8x128xf32>
    tpu.vector_store %arg3[%7, %c0_2], %6 {strides = array<i32>} : memref<8x128xf32, #tpu.memory_space<vmem>>, vector<8x128xf32>,
    %c1_i32 = arith.constant 1 : i32
    return
  }
  func.func @transform_0(%arg0: i32) -> (i32, i32) {
    %c0_i32 = arith.constant 0 : i32
    %c0_i32_0 = arith.constant 0 : i32
    return %arg0, %c0_i32 : i32, i32
  }
  func.func @transform_1(%arg0: i32) -> (i32, i32) {
    %c0_i32 = arith.constant 0 : i32
    %c0_i32_0 = arith.constant 0 : i32
    %c0_i32_1 = arith.constant 0 : i32
    return %c0_i32, %c0_i32_0 : i32, i32
  }
  func.func @transform_2(%arg0: i32) -> (i32, i32) {
    %c0_i32 = arith.constant 0 : i32
    %c0_i32_0 = arith.constant 0 : i32
    return %arg0, %c0_i32 : i32, i32
  }
}

</mosaic_0001>

<bundles_post_ra>
// kernel: tpu_custom_call.1
= control target key start
LH: loop header
LB: loop body
LE: loop exit
PB: predicated region body
PF: predicated region fallthrough
CT: control target
= control target key end

     0   :  { %7 = vsyncpa [#allocation3], 0  ;;  %s847_s0 = inlined_call_operand.hbm [shape: f32[8,5], index: 0, kind: input, shape index: {}]   ;;  %s848_s1 = inlined_call_operand.hbm [shape: f32[5,128], index: 1, kind: input, shape index: {}]   ;;  %s849_s2 = inlined_call_operand.hbm [shape: f32[8,128], index: 2, kind: output, shape index: {}]  }
   0x1   :  { %8 = vsyncpa [#allocation6], 0 }
   0x2   :  { %9 = vsyncpa [#allocation4], 0  ;;  %s758_s9 = smov [#allocation2]   ;;  %s759_s11 = smov [#allocation5]  }
   0x3   :  { %s16_s10 = sshll.u32 %s758_s9, 4  ;;  %s26_s12 = sshll.u32 %s759_s11, 4  ;;  %s17_s10 = int_to_ptr.vmem [resolvable:$true] %s16_s10  ;;  %s27_s12 = int_to_ptr.vmem [resolvable:$true] %s26_s12 }
   0x4   :  { %s686_s15 = scalar_lea.hbm %s847_s0, 128 }
   0x5   :  { %p687_p0 = scmp.ne.s32.totalorder %s847_s0, %s686_s15  ;;  %p690_p1 = scmp.lt.u32.totalorder %s686_s15, %s847_s0 }
   0x7   :  { %p692_p2 = pnand %p690_p1, %p687_p0 }
   0x9   :  { %695 = shalt.err (!%p692_p2)
}
   0xa   :  { %s696_s20 = scalar_lea.vmem %s17_s10, 128  ;;  %p701_p4 = scmp.lt.s32.totalorder %s17_s10, %s17_s10 }
   0xb   :  { %p697_p3 = scmp.ne.s32.totalorder %s17_s10, %s696_s20  ;;  %p702_p5 = scmp.lt.s32.totalorder %s696_s20, %s696_s20 }
   0xd   :  { %p703_p6 = por %p702_p5, %p701_p4 }
   0xf   :  { %p704_p7 = pnand %p703_p6, %p697_p3 }
  0x11   :  { %707 = shalt.err (!%p704_p7)
}
  0x12   :  { %19 = dma.hbm_to_vmem [thread:$0]  %s847_s0, 128, %s17_s10, [#allocation3]  }
  0x13   :  { %s708_s25 = scalar_lea.hbm %s848_s1, 128 }
  0x14   :  { %p709_p8 = scmp.ne.s32.totalorder %s848_s1, %s708_s25  ;;  %p712_p9 = scmp.lt.u32.totalorder %s708_s25, %s848_s1 }
  0x16   :  { %p714_p10 = pnand %p712_p9, %p709_p8 }
  0x18   :  { %717 = shalt.err (!%p714_p10)
}
  0x19   :  { %s718_s30 = scalar_lea.vmem %s27_s12, 128  ;;  %p723_p12 = scmp.lt.s32.totalorder %s27_s12, %s27_s12 }
  0x1a   :  { %p719_p11 = scmp.ne.s32.totalorder %s27_s12, %s718_s30  ;;  %p724_p13 = scmp.lt.s32.totalorder %s718_s30, %s718_s30 }
  0x1c   :  { %p725_p0 = por %p724_p13, %p723_p12 }
  0x1e   :  { %p726_p1 = pnand %p725_p0, %p719_p11 }
  0x20   :  { %729 = shalt.err (!%p726_p1)
}
  0x21   :  { %29 = dma.hbm_to_vmem [thread:$0]  %s848_s1, 128, %s27_s12, [#allocation6]  }
  0x22   :  { %752 = dma.done.wait [#allocation3], 128  }
  0x23   :  { %753 = vsyncadd [#allocation3], 4294967168 }
  0x24   :  { %754 = dma.done.wait [#allocation6], 128  }
  0x25   :  { %755 = vsyncadd [#allocation6], 4294967168  ;;  %v760_v0 = vmov 0.0   ;;  %vm761_vm0 = vmmov 0   ;;  %vm42_vm1 = vcmask 1044480   ;;  %vm38_vm2 = vcmask 39936  }
  0x26   :  { %643 = vmatprep.subr.mxu0 %v760_v0  ;;  %645 = vmatprep.mubr.msk.f32.mxu0 %vm761_vm0, %v760_v0  ;;  %v36_v1 = vld [vmem:[#allocation5] sm:$0x1f]  ;;  %v37_v2 = vld [vmem:[#allocation2] sm:$0xff]  ;;  %v762_v30 = vmov 683565275   ;;  %s768_s1 = smov [#allocation7]  }
  0x27   :  { %628 = vmatprep.subr.mxu1 %v760_v0  ;;  %630 = vmatprep.mubr.msk.f32.mxu1 %vm761_vm0, %v760_v0  ;;  %v44_v3 = vsel %vm42_vm1, %v36_v1, 0  ;;  %v40_v4 = vsel %vm38_vm2, %v37_v2, 0  ;;  %v763_v32 = vmov 2475754826   ;;  %v764_v35 = vmov 2131351028  }
  0x28   :  { %v47_v5 = vand.u32 4294901760, %v44_v3  ;;  %v112_v6 = vand.u32 4294901760, %v40_v4  ;;  %v765_v38 = vmov 2102212464   ;;  %v766_v41 = vmov 920167782  }
  0x29   :  { %v767_v44 = vmov 1326507024   ;;  %s602_s4 = sshll.u32 %s768_s1, 4  ;;  %s603_s4 = int_to_ptr.vmem [resolvable:$true] %s602_s4 }
  0x2a   :  { %v124_v7 = vsub.f32 %v44_v3, %v47_v5  ;;  %644 = vmatpush3.msra.mxu0 %v47_v5  ;;  %v113_v8 = vsub.f32 %v40_v4, %v112_v6  ;;  %629 = vmatpush3.msra.mxu1 %v47_v5  ;;  %s730_s5 = scalar_lea.vmem %s603_s4, 128  ;;  %p735_p3 = scmp.lt.s32.totalorder %s603_s4, %s603_s4 }
  0x2b   :  { %633 = vmatprep.subr.mxu1 %v760_v0  ;;  %648 = vmatprep.subr.mxu0 %v760_v0  ;;  %p731_p2 = scmp.ne.s32.totalorder %s603_s4, %s730_s5  ;;  %p736_p4 = scmp.lt.s32.totalorder %s730_s5, %s730_s5 }
  0x2c   :  { %v114_v9 = vand.u32 4294901760, %v113_v8  ;;  %v125_v10 = vand.u32 4294901760, %v124_v7 }
  0x2d   :  { %p737_p5 = por %p736_p4, %p735_p3 }
  0x2e   :  { %646 = vmatmul.mubr.f32.vlgmr.msra.gmra.mrb[0].mxu0 %v114_v9  ;;  %v115_v11 = vsub.f32 %v113_v8, %v114_v9  ;;  %v126_v12 = vsub.f32 %v124_v7, %v125_v10 }
  0x2f   :  { %649 = vmatpush3.msra.mxu0 %v125_v10  ;;  %650 = vmatprep.mubr.msk.f32.mxu0 %vm761_vm0, %v760_v0  ;;  %p738_p6 = pnand %p737_p5, %p731_p2 }
  0x30   :  { %v116_v13 = vand.u32 4294901760, %v115_v11  ;;  %v127_v14 = vand.u32 4294901760, %v126_v12  ;;  %653 = vmatprep.subr.mxu0 %v760_v0 }
  0x32   :  { %631 = vmatmul.mubr.f32.vlgmr.msra.gmra.mrb[0].mxu1 %v116_v13 }
  0x33   :  { %634 = vmatpush3.msra.mxu1 %v127_v14  ;;  %635 = vmatprep.mubr.msk.f32.mxu1 %vm761_vm0, %v760_v0 }
  0x34   :  { %638 = vmatprep.subr.mxu1 %v760_v0 }
  0x36   :  { %651 = vmatmul.mubr.f32.vlgmr.msra.gmra.mrb[0].mxu0 %v112_v6 }
  0x37   :  { %654 = vmatpush3.msra.mxu0 %v47_v5  ;;  %655 = vmatprep.mubr.msk.f32.mxu0 %vm761_vm0, %v760_v0 }
  0x3a   :  { %636 = vmatmul.mubr.f32.vlgmr.msra.gmra.mrb[0].mxu1 %v112_v6 }
  0x3b   :  { %639 = vmatpush3.msra.mxu1 %v124_v7  ;;  %640 = vmatprep.mubr.msk.f32.mxu1 %vm761_vm0, %v760_v0 }
  0x3e   :  { %656 = vmatmul.mubr.f32.vlgmr.msra.gmra.mrb[0].mxu0 %v112_v6 }
  0x42   :  { %641 = vmatmul.mubr.f32.vlgmr.msra.gmra.mrb[0].mxu1 %v113_v8 }
 0x111   :  { %v488_v15 = vpop.f32.mrb[0].mxu0 }
 0x112   :  { %v657_v16 = vpop.f32.mrb[1].mxu0 }
 0x115   :  { %v268_v17 = vpop.f32.mrb[0].mxu1 }
 0x116   :  { %v814_v18 = vadd.f32 %v488_v15, %v268_v17  ;;  %v642_v19 = vpop.f32.mrb[1].mxu1 }
 0x118   :  { %v495_v20 = vand.u32 2139095040, %v814_v18  ;;  %v492_v24 = vand.u32 2147483647, %v814_v18  ;;  %vm494_vm10 = vcmp.lt.s32.totalorder %v814_v18, 0  ;;  %vm584_vm15 = vweird.f32 %v814_v18 }
 0x11a   :  { %v496_v21 = vshrl.u32 %v495_v20, 23  ;;  %v499_v27 = vand.u32 8388607, %v492_v24  ;;  %vm493_vm11 = vcmp.le.f32.partialorder %v492_v24, 0.7853982 }
 0x11c   :  { %v612_v22 = vadd.s32 4294967169, %v496_v21  ;;  %v500_v46 = vor.u32 8388608, %v499_v27 }
 0x11e   :  { %v502_v23 = vadd.s32 1, %v612_v22  ;;  %v540_v60 = vshll.u32 %v500_v46, 8 }
 0x120   :  { %vm503_vm3 = vcmp.gt.s32.totalorder %v502_v23, 0 }
 0x121   :  { %v504_v25 = vsel %vm503_vm3, %v502_v23, 0 }
 0x122   :  { %v506_v26 = vand.u32 31, %v504_v25  ;;  %v505_v29 = vshrl.u32 %v504_v25, 5 }
 0x124   :  { %v507_v28 = vsub.s32 32, %v506_v26  ;;  %v509_v31 = vshll.u32 %v762_v30, %v506_v26  ;;  %v512_v33 = vshll.u32 %v763_v32, %v506_v26  ;;  %v515_v37 = vshll.u32 %v764_v35, %v506_v26 }
 0x125   :  { %v518_v40 = vshll.u32 %v765_v38, %v506_v26  ;;  %v521_v43 = vshll.u32 %v766_v41, %v506_v26  ;;  %vm524_vm4 = vcmp.lt.s32.totalorder %v505_v29, 1  ;;  %vm527_vm5 = vcmp.lt.s32.totalorder %v505_v29, 4 }
 0x126   :  { %v510_v34 = vshrl.u32 %v763_v32, %v507_v28  ;;  %v513_v36 = vshrl.u32 %v764_v35, %v507_v28  ;;  %v516_v39 = vshrl.u32 %v765_v38, %v507_v28  ;;  %v519_v42 = vshrl.u32 %v766_v41, %v507_v28 }
 0x127   :  { %v522_v45 = vshrl.u32 %v767_v44, %v507_v28  ;;  %v508_v55 = vshrl.u32 %v762_v30, %v507_v28  ;;  %vm526_vm6 = vcmp.lt.s32.totalorder %v505_v29, 3  ;;  %vm525_vm7 = vcmp.lt.s32.totalorder %v505_v29, 2 }
 0x128   :  { %v511_v47 = vor.u32 %v510_v34, %v509_v31  ;;  %v514_v48 = vor.u32 %v513_v36, %v512_v33  ;;  %v517_v49 = vor.u32 %v516_v39, %v515_v37  ;;  %v520_v50 = vor.u32 %v519_v42, %v518_v40 }
 0x129   :  { %v523_v51 = vor.u32 %v522_v45, %v521_v43 }
 0x12a   :  { %v529_v52 = vsel %vm527_vm5, %v517_v49, 2102212464  ;;  %v532_v53 = vsel %vm524_vm4, %v511_v47, %v514_v48  ;;  %v536_v54 = vsel %vm524_vm4, %v514_v48, %v517_v49  ;;  %v533_v56 = vsel %vm527_vm5, %v520_v50, 920167782 }
 0x12b   :  { %v537_v57 = vsel %vm527_vm5, %v523_v51, 1326507024  ;;  %v534_v58 = vsel %vm526_vm6, %v517_v49, %v533_v56  ;;  %v528_v61 = vsel %vm524_vm4, %v508_v55, %v511_v47  ;;  %v530_v62 = vsel %vm526_vm6, %v514_v48, %v529_v52 }
 0x12c   :  { %v538_v59 = vsel %vm526_vm6, %v520_v50, %v537_v57  ;;  %v535_v63 = vsel %vm525_vm7, %v532_v53, %v534_v58  ;;  %v531_v5 = vsel %vm525_vm7, %v528_v61, %v530_v62 }
 0x12d   :  { %v539_v0 = vsel %vm525_vm7, %v536_v54, %v538_v59  ;;  %v823_v3 = vmul.u32.u64.low %v540_v60, %v535_v63  ;;  %v824_v4 = vmul.u32.u64.high %v540_v60, %v535_v63, %v823_v3  ;;  %v547_v7 = vmul.u32 %v540_v60, %v531_v5 }
 0x12e   :  { %v820_v1 = vmul.u32.u64.low %v540_v60, %v539_v0  ;;  %v821_v2 = vmul.u32.u64.high %v540_v60, %v539_v0, %v820_v1 }
 0x12f   :  { %v550_v6 = vadd.s32 1, %v824_v4 }
 0x130   :  { %vm549_vm8 = vc.u32 %v821_v2, %v823_v3  ;;  %v548_v20 = vadd.s32 %v823_v3, %v821_v2 }
 0x131   :  { %v551_v8 = vsel %vm549_vm8, %v550_v6, %v824_v4 }
 0x132   :  { %v552_v9 = vadd.s32 %v551_v8, %v547_v7 }
 0x134   :  { %v553_v10 = vadd.s32 536870912, %v552_v9 }
 0x136   :  { %v554_v11 = vshrl.u32 %v553_v10, 30 }
 0x138   :  { %v555_v12 = vshll.u32 %v554_v11, 30  ;;  %v578_v35 = vsub.s32 4, %v554_v11 }
 0x13a   :  { %v556_v13 = vsub.s32 %v552_v9, %v555_v12  ;;  %v579_v37 = vsel %vm494_vm10, %v578_v35, %v554_v11 }
 0x13b   :  { %v581_v38 = vsel %vm493_vm11, 0, %v579_v37 }
 0x13c   :  { %v558_v14 = vsub.s32 0, %v556_v13  ;;  %v585_v39 = vand.u32 3, %v581_v38 }
 0x13e   :  { %v613_v15 = vmin.u32 %v558_v14, %v556_v13  ;;  %vm590_vm12 = vcmp.eq.s32.totalorder %v585_v39, 2  ;;  %vm587_vm13 = vcmp.eq.s32.totalorder %v585_v39, 0  ;;  %vm586_vm14 = vcmp.lt.s32.totalorder %v585_v39, 2 }
 0x140   :  { %v560_v16 = vclz %v613_v15 }
 0x142   :  { %v614_v17 = vadd.s32 4294967294, %v560_v16 }
 0x144   :  { %vm615_vm9 = vcmp.lt.s32.totalorder %v614_v17, 0 }
 0x145   :  { %v563_v19 = vsel %vm615_vm9, 0, %v614_v17 }
 0x146   :  { %v564_v21 = vsub.s32 32, %v563_v19  ;;  %v568_v22 = vsub.s32 4294967266, %v563_v19  ;;  %v565_v23 = vshll.u32 %v556_v13, %v563_v19 }
 0x148   :  { %v566_v25 = vshrl.u32 %v548_v20, %v564_v21  ;;  %v569_v26 = vadd.s32 127, %v568_v22 }
 0x14a   :  { %v567_v27 = vor.u32 %v566_v25, %v565_v23  ;;  %v570_v28 = vshll.u32 %v569_v26, 23 }
 0x14c   :  { %v571_v29 = vor.u32 4788187, %v570_v28  ;;  %v574_v31 = vcvt.s32.f32 %v567_v27 }
 0x14e   :  { %v572_v30 = vand.u32 2147483647, %v571_v29 }
 0x150   :  { %v575_v32 = vmul.f32 %v574_v31, %v572_v30 }
 0x152   :  { %v576_v33 = vxor.u32 2147483648, %v575_v32 }
 0x154   :  { %v577_v34 = vsel %vm494_vm10, %v576_v33, %v575_v32 }
 0x155   :  { %v580_v36 = vsel %vm493_vm11, %v814_v18, %v577_v34 }
 0x156   :  { %682 = vcosq.f32 %v580_v36 }
 0x157   :  { %684 = vsinq.f32 %v580_v36 }
 0x160   :  { %v683_v40 = vpop.eup %682 }
 0x161   :  { %v685_v41 = vpop.eup %684  ;;  %v591_v42 = vxor.u32 2147483648, %v683_v40 }
 0x162   :  { %v588_v43 = vxor.u32 2147483648, %v685_v41 }
 0x163   :  { %v592_v44 = vsel %vm590_vm12, %v591_v42, %v685_v41 }
 0x164   :  { %v589_v45 = vsel %vm587_vm13, %v683_v40, %v588_v43 }
 0x165   :  { %v593_v24 = vsel %vm586_vm14, %v589_v45, %v592_v44 }
 0x166   :  { %v594_v46 = vsel %vm584_vm15, nan, %v593_v24 }
 0x167   :  { %595 = vst [vmem:[#allocation7] sm:$0xff] %v594_v46 }
 0x168   :  { %741 = shalt.err (!%p738_p6)
}
 0x169   :  { %s742_s8 = scalar_lea.hbm %s849_s2, 128 }
 0x16a   :  { %p743_p7 = scmp.ne.s32.totalorder %s849_s2, %s742_s8  ;;  %p746_p8 = scmp.lt.u32.totalorder %s742_s8, %s849_s2 }
 0x16c   :  { %p748_p9 = pnand %p746_p8, %p743_p7 }
 0x16e   :  { %751 = shalt.err (!%p748_p9)
}
 0x16f   :  { %605 = dma.vmem_to_hbm [thread:$0]  %s603_s4, 128, %s849_s2, [#allocation4]  }
 0x170   :  { %756 = dma.done.wait [#allocation4], 128  }
 0x171   :  { %757 = vsyncadd [#allocation4], 4294967168 }
 0x172   :  { %609 = vsyncpa [#allocation3], 1 }
 0x173   :  { %610 = vsyncpa [#allocation6], 1 }
 0x174   :  { %611 = vsyncpa [#allocation4], 1 }

</bundles_post_ra>
